<compile_context>
chip_gen: v7x
topology: tpu7x:2x2x1
jax: 0.10.0
libtpu: 0.0.40
codegen_flags: <defaults>
</compile_context>

<pallas_src>
import jax
import jax.numpy as jnp
from jax.experimental import pallas as pl
from jax.experimental.pallas import tpu as pltpu

HIDDEN = 24   # fixed by the module definition


def critic_kernel(x_ref, w1_ref, b1_ref, w2_ref, b2_ref, w3_ref, b3_ref, out_ref):
    x = x_ref[...]

    # lin1: Linear + ReLU
    h = jnp.dot(x, w1_ref[...], preferred_element_type=jnp.float32) + b1_ref[...]
    h = jnp.maximum(h, 0.0)

    # lin2: Linear + ReLU
    h = jnp.dot(h, w2_ref[...], preferred_element_type=jnp.float32) + b2_ref[...]
    h = jnp.maximum(h, 0.0)

    # final_lin: Linear (exact n_actions columns; masked store is fine here)
    out = jnp.dot(h, w3_ref[...], preferred_element_type=jnp.float32) + b3_ref[...]
    out_ref[...] = out.astype(out_ref.dtype)


def _round_up(v, m):
    return ((v + m - 1) // m) * m


def critic_forward(x, w1, b1, w2, b2, w3, b3, *, tb=None):
    """x: (B, n_states) f32 -> (B, n_actions) f32 Q-values."""
    B, n_states = x.shape
    n_actions = w3.shape[1]

    # Batch tile: big enough to amortize per-step overhead (target 1024, within the
    # 512-2048 sweet spot), but ensure >=2 grid steps when B >= 16 so the
    # "parallel" grid axis can occupy both TensorCores on v7x.
    if tb is None:
        target = 1024
        if B >= 16:
            tb = min(target, _round_up(pl.cdiv(B, 2), 8))
        else:
            tb = _round_up(max(B, 1), 8)
    tb = max(8, _round_up(int(tb), 8))
    n_tiles = pl.cdiv(B, tb)

    flops = 2 * B * (n_states * HIDDEN + HIDDEN * HIDDEN + HIDDEN * n_actions)
    bytes_accessed = 4 * (
        B * (n_states + n_actions)                       # activations in/out
        + n_states * HIDDEN + HIDDEN                     # w1, b1
        + HIDDEN * HIDDEN + HIDDEN                       # w2, b2
        + HIDDEN * n_actions + n_actions                 # w3, b3
    )

    return pl.pallas_call(
        critic_kernel,
        out_shape=jax.ShapeDtypeStruct((B, n_actions), jnp.float32),
        grid=(n_tiles,),
        in_specs=[
            pl.BlockSpec((tb, n_states), lambda i: (i, 0)),        # x: tiled over batch
            pl.BlockSpec((n_states, HIDDEN), lambda i: (0, 0)),    # w1
            pl.BlockSpec((1, HIDDEN), lambda i: (0, 0)),           # b1
            pl.BlockSpec((HIDDEN, HIDDEN), lambda i: (0, 0)),      # w2
            pl.BlockSpec((1, HIDDEN), lambda i: (0, 0)),           # b2
            pl.BlockSpec((HIDDEN, n_actions), lambda i: (0, 0)),   # w3
            pl.BlockSpec((1, n_actions), lambda i: (0, 0)),        # b3
        ],
        out_specs=pl.BlockSpec((tb, n_actions), lambda i: (i, 0)),
        compiler_params=pltpu.CompilerParams(
            dimension_semantics=("parallel",),   # megacore: shard batch tiles across TCs
        ),
        cost_estimate=pl.CostEstimate(
            flops=flops, transcendentals=0, bytes_accessed=bytes_accessed),
    )(x, w1, b1, w2, b2, w3, b3)


def init_critic_params(key, n_states, n_actions):
    """Deterministic init mimicking torch.nn.Linear (U[-1/sqrt(fan_in), +1/sqrt(fan_in)]).

    Weights stored pre-transposed as (in_features, out_features); biases as (1, out) rows.
    """
    k1, k2, k3, k4, k5, k6 = jax.random.split(key, 6)
    bound1 = 1.0 / jnp.sqrt(jnp.float32(n_states))
    bound2 = 1.0 / jnp.sqrt(jnp.float32(HIDDEN))
    w1 = jax.random.uniform(k1, (n_states, HIDDEN), jnp.float32, -bound1, bound1)
    b1 = jax.random.uniform(k2, (1, HIDDEN), jnp.float32, -bound1, bound1)
    w2 = jax.random.uniform(k3, (HIDDEN, HIDDEN), jnp.float32, -bound2, bound2)
    b2 = jax.random.uniform(k4, (1, HIDDEN), jnp.float32, -bound2, bound2)
    w3 = jax.random.uniform(k5, (HIDDEN, n_actions), jnp.float32, -bound2, bound2)
    b3 = jax.random.uniform(k6, (1, n_actions), jnp.float32, -bound2, bound2)
    return w1, b1, w2, b2, w3, b3


def critic_reference(x, w1, b1, w2, b2, w3, b3):
    h = jnp.maximum(x @ w1 + b1, 0.0)
    h = jnp.maximum(h @ w2 + b2, 0.0)
    return h @ w3 + b3


if __name__ == "__main__":
    n_states, n_actions = 8, 4

    key = jax.random.PRNGKey(0)
    kx, kp = jax.random.split(key)
    params = init_critic_params(kp, n_states, n_actions)

    # Case 1: small batch, single grid step (tile == full batch).
    x_small = jax.random.normal(kx, (8, n_states), jnp.float32)
    out_small = jax.block_until_ready(critic_forward(x_small, *params))
    ref_small = critic_reference(x_small, *params)
    assert out_small.shape == (8, n_actions)
    assert jnp.allclose(out_small, ref_small, atol=1e-5, rtol=1e-5)

    # Case 2: default tile selection -> 2 grid steps with a partial last tile
    # (exercises the no-pad / masked-writeback path and the v7x >=2-tile rule).
    x_mid = jax.random.normal(jax.random.fold_in(kx, 1), (20, n_states), jnp.float32)
    out_mid = jax.block_until_ready(critic_forward(x_mid, *params))
    ref_mid = critic_reference(x_mid, *params)
    assert out_mid.shape == (20, n_actions)
    assert jnp.allclose(out_mid, ref_mid, atol=1e-5, rtol=1e-5)

    # Case 3: explicit small tile, batch not a multiple of the tile.
    x_big = jax.random.normal(jax.random.fold_in(kx, 2), (20, n_states), jnp.float32)
    out_big = jax.block_until_ready(critic_forward(x_big, *params, tb=8))
    ref_big = critic_reference(x_big, *params)
    assert out_big.shape == (20, n_actions)
    assert jnp.allclose(out_big, ref_big, atol=1e-5, rtol=1e-5)

    print("KERNEL_OK")
</pallas_src>

<mosaic_0001>
module attributes {stable_mosaic.version = 11 : i64} {
  func.func @critic_kernel(%arg0: i32, %arg1: memref<8x8xf32, #tpu.memory_space<vmem>>, %arg2: memref<8x24xf32, #tpu.memory_space<vmem>>, %arg3: memref<1x24xf32, #tpu.memory_space<vmem>>, %arg4: memref<24x24xf32, #tpu.memory_space<vmem>>, %arg5: memref<1x24xf32, #tpu.memory_space<vmem>>, %arg6: memref<24x4xf32, #tpu.memory_space<vmem>>, %arg7: memref<1x4xf32, #tpu.memory_space<vmem>>, %arg8: memref<8x4xf32, #tpu.memory_space<vmem>>) attributes {dimension_semantics = [#tpu.dimension_semantics<parallel>], iteration_bounds = array<i64: 1>, scalar_prefetch = 0 : i64, scratch_operands = 0 : i64, tpu.core_type = #tpu.core_type<tc>, window_params = [{transform_indices = @transform_0, window_bounds = array<i64: 8, 8>}, {pipeline_mode = #tpu.pipeline_mode<synchronous>, transform_indices = @transform_1, window_bounds = array<i64: 8, 24>}, {pipeline_mode = #tpu.pipeline_mode<synchronous>, transform_indices = @transform_2, window_bounds = array<i64: 1, 24>}, {pipeline_mode = #tpu.pipeline_mode<synchronous>, transform_indices = @transform_3, window_bounds = array<i64: 24, 24>}, {pipeline_mode = #tpu.pipeline_mode<synchronous>, transform_indices = @transform_4, window_bounds = array<i64: 1, 24>}, {pipeline_mode = #tpu.pipeline_mode<synchronous>, transform_indices = @transform_5, window_bounds = array<i64: 24, 4>}, {pipeline_mode = #tpu.pipeline_mode<synchronous>, transform_indices = @transform_6, window_bounds = array<i64: 1, 4>}, {transform_indices = @transform_7, window_bounds = array<i64: 8, 4>}]} {
    %c0 = arith.constant 0 : index
    %c0_0 = arith.constant 0 : index
    %0 = vector.load %arg1[%c0, %c0_0] : memref<8x8xf32, #tpu.memory_space<vmem>>, vector<8x8xf32>
    %c0_1 = arith.constant 0 : index
    %c0_2 = arith.constant 0 : index
    %1 = vector.load %arg2[%c0_1, %c0_2] : memref<8x24xf32, #tpu.memory_space<vmem>>, vector<8x24xf32>
    %cst = arith.constant dense<0.000000e+00> : vector<8x24xf32>
    %2 = tpu.matmul %0, %1, %cst {dimension_numbers = #tpu.dot_dimension_numbers<[1], [0], [0], [1], [0, 0, 1, 1], [], []>} : vector<8x8xf32>, vector<8x24xf32>, vector<8x24xf32> -> vector<8x24xf32>
    %c0_3 = arith.constant 0 : index
    %c0_4 = arith.constant 0 : index
    %3 = vector.load %arg3[%c0_3, %c0_4] : memref<1x24xf32, #tpu.memory_space<vmem>>, vector<1x24xf32>
    %4 = vector.broadcast %3 : vector<1x24xf32> to vector<8x24xf32>
    %5 = arith.addf %2, %4 : vector<8x24xf32>
    %cst_5 = arith.constant 0.000000e+00 : f32
    %6 = vector.broadcast %cst_5 : f32 to vector<8x24xf32>
    %7 = arith.maximumf %5, %6 : vector<8x24xf32>
    %c0_6 = arith.constant 0 : index
    %c0_7 = arith.constant 0 : index
    %8 = vector.load %arg4[%c0_6, %c0_7] : memref<24x24xf32, #tpu.memory_space<vmem>>, vector<24x24xf32>
    %cst_8 = arith.constant dense<0.000000e+00> : vector<8x24xf32>
    %9 = tpu.matmul %7, %8, %cst_8 {dimension_numbers = #tpu.dot_dimension_numbers<[1], [0], [0], [1], [0, 0, 1, 1], [], []>} : vector<8x24xf32>, vector<24x24xf32>, vector<8x24xf32> -> vector<8x24xf32>
    %c0_9 = arith.constant 0 : index
    %c0_10 = arith.constant 0 : index
    %10 = vector.load %arg5[%c0_9, %c0_10] : memref<1x24xf32, #tpu.memory_space<vmem>>, vector<1x24xf32>
    %11 = vector.broadcast %10 : vector<1x24xf32> to vector<8x24xf32>
    %12 = arith.addf %9, %11 : vector<8x24xf32>
    %cst_11 = arith.constant 0.000000e+00 : f32
    %13 = vector.broadcast %cst_11 : f32 to vector<8x24xf32>
    %14 = arith.maximumf %12, %13 : vector<8x24xf32>
    %c0_12 = arith.constant 0 : index
    %c0_13 = arith.constant 0 : index
    %15 = vector.load %arg6[%c0_12, %c0_13] : memref<24x4xf32, #tpu.memory_space<vmem>>, vector<24x4xf32>
    %cst_14 = arith.constant dense<0.000000e+00> : vector<8x4xf32>
    %16 = tpu.matmul %14, %15, %cst_14 {dimension_numbers = #tpu.dot_dimension_numbers<[1], [0], [0], [1], [0, 0, 1, 1], [], []>} : vector<8x24xf32>, vector<24x4xf32>, vector<8x4xf32> -> vector<8x4xf32>
    %c0_15 = arith.constant 0 : index
    %c0_16 = arith.constant 0 : index
    %17 = vector.load %arg7[%c0_15, %c0_16] : memref<1x4xf32, #tpu.memory_space<vmem>>, vector<1x4xf32>
    %18 = vector.broadcast %17 : vector<1x4xf32> to vector<8x4xf32>
    %19 = arith.addf %16, %18 : vector<8x4xf32>
    %c0_17 = arith.constant 0 : index
    %c0_18 = arith.constant 0 : index
    %20 = vector.load %arg8[%c0_17, %c0_18] : memref<8x4xf32, #tpu.memory_space<vmem>>, vector<8x4xf32>
    tpu.vector_store %arg8[%c0_17, %c0_18], %19 {strides = array<i32>} : memref<8x4xf32, #tpu.memory_space<vmem>>, vector<8x4xf32>,
    return
  }
  func.func @transform_0(%arg0: i32) -> (i32, i32) {
    %c0_i32 = arith.constant 0 : i32
    %c0_i32_0 = arith.constant 0 : i32
    return %arg0, %c0_i32 : i32, i32
  }
  func.func @transform_1(%arg0: i32) -> (i32, i32) {
    %c0_i32 = arith.constant 0 : i32
    %c0_i32_0 = arith.constant 0 : i32
    %c0_i32_1 = arith.constant 0 : i32
    return %c0_i32, %c0_i32_0 : i32, i32
  }
  func.func @transform_2(%arg0: i32) -> (i32, i32) {
    %c0_i32 = arith.constant 0 : i32
    %c0_i32_0 = arith.constant 0 : i32
    %c0_i32_1 = arith.constant 0 : i32
    return %c0_i32, %c0_i32_0 : i32, i32
  }
  func.func @transform_3(%arg0: i32) -> (i32, i32) {
    %c0_i32 = arith.constant 0 : i32
    %c0_i32_0 = arith.constant 0 : i32
    %c0_i32_1 = arith.constant 0 : i32
    return %c0_i32, %c0_i32_0 : i32, i32
  }
  func.func @transform_4(%arg0: i32) -> (i32, i32) {
    %c0_i32 = arith.constant 0 : i32
    %c0_i32_0 = arith.constant 0 : i32
    %c0_i32_1 = arith.constant 0 : i32
    return %c0_i32, %c0_i32_0 : i32, i32
  }
  func.func @transform_5(%arg0: i32) -> (i32, i32) {
    %c0_i32 = arith.constant 0 : i32
    %c0_i32_0 = arith.constant 0 : i32
    %c0_i32_1 = arith.constant 0 : i32
    return %c0_i32, %c0_i32_0 : i32, i32
  }
  func.func @transform_6(%arg0: i32) -> (i32, i32) {
    %c0_i32 = arith.constant 0 : i32
    %c0_i32_0 = arith.constant 0 : i32
    %c0_i32_1 = arith.constant 0 : i32
    return %c0_i32, %c0_i32_0 : i32, i32
  }
  func.func @transform_7(%arg0: i32) -> (i32, i32) {
    %c0_i32 = arith.constant 0 : i32
    %c0_i32_0 = arith.constant 0 : i32
    return %arg0, %c0_i32 : i32, i32
  }
}

</mosaic_0001>

<bundles_post_ra>
// kernel: tpu_custom_call.1
= control target key start
LH: loop header
LB: loop body
LE: loop exit
PB: predicated region body
PF: predicated region fallthrough
CT: control target
= control target key end

     0   :  { %12 = vsyncpa [#allocation3], 0  ;;  %s370_s24 = smov [#allocation2]   ;;  %s459_s0 = inlined_call_operand.vmem [shape: f32[8,8], index: 0, kind: input, shape index: {}]   ;;  %s460_s1 = inlined_call_operand.hbm [shape: f32[8,24], index: 1, kind: input, shape index: {}]   ;;  %s461_s2 = inlined_call_operand.vmem [shape: f32[1,24], index: 2, kind: input, shape index: {}]   ;;  %s462_s3 = inlined_call_operand.vmem [shape: f32[24,24], index: 3, kind: input, shape index: {}]   ;;  %s463_s4 = inlined_call_operand.vmem [shape: f32[1,24], index: 4, kind: input, shape index: {}]   ;;  %s464_s5 = inlined_call_operand.vmem [shape: f32[24,4], index: 5, kind: input, shape index: {}]   ;;  %s465_s6 = inlined_call_operand.vmem [shape: f32[1,4], index: 6, kind: input, shape index: {}]   ;;  %s466_s7 = inlined_call_operand.vmem [shape: f32[8,4], index: 7, kind: output, shape index: {}]  }
   0x1   :  { %s21_s25 = sshll.u32 %s370_s24, 4  ;;  %s346_s28 = scalar_lea.hbm %s460_s1, 128  ;;  %s22_s25 = int_to_ptr.vmem [resolvable:$true] %s21_s25 }
   0x2   :  { %p347_p0 = scmp.ne.s32.totalorder %s460_s1, %s346_s28  ;;  %p350_p1 = scmp.lt.u32.totalorder %s346_s28, %s460_s1 }
   0x4   :  { %p352_p2 = pnand %p350_p1, %p347_p0 }
   0x6   :  { %355 = shalt.err (!%p352_p2)
}
   0x7   :  { %s356_s10 = scalar_lea.vmem %s22_s25, 128  ;;  %p361_p4 = scmp.lt.s32.totalorder %s22_s25, %s22_s25 }
   0x8   :  { %p357_p3 = scmp.ne.s32.totalorder %s22_s25, %s356_s10  ;;  %p362_p5 = scmp.lt.s32.totalorder %s356_s10, %s356_s10 }
   0xa   :  { %p363_p6 = por %p362_p5, %p361_p4 }
   0xc   :  { %p364_p7 = pnand %p363_p6, %p357_p3 }
   0xe   :  { %367 = shalt.err (!%p364_p7)
}
   0xf   :  { %24 = dma.hbm_to_vmem [thread:$0]  %s460_s1, 128, %s22_s25, [#allocation3]  }
  0x10   :  { %368 = dma.done.wait [#allocation3], 128  }
  0x11   :  { %369 = vsyncadd [#allocation3], 4294967168  ;;  %v371_v0 = vmov 0.0   ;;  %vm372_vm0 = vmmov 0   ;;  %v373_v1 = vmov 0.0|0.0   ;;  %vm47_vm1 = vcmask 64512  }
  0x12   :  { %313 = vmatprep.subr.mxu0 %v371_v0  ;;  %315 = vmatprep.mubr.msk.f32.mxu0 %vm372_vm0, %v371_v0  ;;  %v39_v2 = vld [vmem:[#allocation2] sm:$0xff]  ;;  %v123_v5 = vld [vmem:[%s462_s3 + $0x8] sm:$0xff]  ;;  %v124_v7 = vld [vmem:[%s462_s3 + $0x10] sm:$0xff]  ;;  %vm132_vm2 = vcmask 195584   ;;  %vm290_vm3 = vcmask 31744  }
  0x13   :  { %336 = vmatprep.subr.bf16.mxu1 %v373_v1  ;;  %324 = vmatprep.mubr.msk.f32.mxu1 %vm372_vm0, %v371_v0  ;;  %v38_v3 = vld [vmem:[%s459_s0] sm:$0xff]  ;;  %v208_v9 = vld [vmem:[%s464_s5 + $0x8] sm:$0xff]  ;;  %v209_v16 = vld [vmem:[%s464_s5 + $0x10] sm:$0xff] }
  0x14   :  { %314 = vmatpush3.msra.mxu0 %v39_v2  ;;  %v122_v4 = vld [vmem:[%s462_s3] sm:$0xff] }
  0x15   :  { %316 = vmatmul.mubr.msk.f32.vlgmr.msra.gmra.mrb[0].mxu0 %vm47_vm1, %v38_v3  ;;  %339 = vmatprep.subr.bf16.mxu0 %v373_v1  ;;  %v337_v6 = vpack.c.bf16 %v123_v5, %v122_v4  ;;  %v207_v8 = vld [vmem:[%s464_s5] sm:$0xff] }
  0x16   :  { %333 = vmatprep.mubr.msk.f32.mxu0 %vm372_vm0, %v371_v0  ;;  %v340_v10 = vpack.c.bf16 %v208_v9, %v207_v8  ;;  %v297_v11 = vld [vmem:[%s461_s2] ss:$0 sm:$0xff] }
  0x17   :  { %338 = vmatpush3.bf16.msra.mxu1 %v337_v6  ;;  %v299_v17 = vld [vmem:[%s463_s4] ss:$0 sm:$0xff] }
  0x18   :  { %322 = vmatprep.subr.mxu1 %v371_v0  ;;  %341 = vmatpush3.bf16.msra.mxu0 %v340_v10  ;;  %v301_v22 = vld [vmem:[%s465_s6] ss:$0 sm:$0xff] }
  0x19   :  { %331 = vmatprep.subr.mxu0 %v371_v0 }
  0x1b   :  { %323 = vmatpush3.msra.mxu1 %v124_v7 }
  0x1c   :  { %332 = vmatpush3.msra.mxu0 %v209_v16 }
  0xe8   :  { %v117_v12 = vpop.f32.mrb[0].mxu0 }
  0xe9   :  { %v118_v13 = vadd.f32 %v297_v11, %v117_v12  ;;  %v317_v14 = vpop.f32.mrb[1].mxu0 }
  0xeb   :  { %v121_v15 = vmax.f32 %v118_v13, 0.0 }
  0xed   :  { %325 = vmatmul.mubr.msk.f32.vlgmr.msra.gmra.mrb[0].mxu1 %vm132_vm2, %v121_v15 }
 0x1c0   :  { %v202_v18 = vpop.f32.mrb[0].mxu1 }
 0x1c1   :  { %v203_v19 = vadd.f32 %v299_v17, %v202_v18  ;;  %v326_v20 = vpop.f32.mrb[1].mxu1 }
 0x1c3   :  { %v206_v21 = vmax.f32 %v203_v19, 0.0 }
 0x1c5   :  { %334 = vmatmul.mubr.msk.f32.vlgmr.msra.gmra.mrb[2].mxu0 %vm132_vm2, %v206_v21 }
 0x298   :  { %v286_v23 = vpop.f32.mrb[2].mxu0 }
 0x299   :  { %v287_v24 = vadd.f32 %v301_v22, %v286_v23  ;;  %v335_v25 = vpop.f32.mrb[3].mxu0 }
 0x29b   :  { %291 = vst.msk [vmem:[%s466_s7] sm:$0xff] %vm290_vm3, %v287_v24 }
 0x29c   :  { %296 = vsyncpa [#allocation3], 1 }

</bundles_post_ra>
